<compile_context>
chip_gen: v5e
topology: v5e:2x2
jax: 0.10.0
libtpu: 0.0.40
codegen_flags: <defaults>
</compile_context>

<pallas_src>
import jax
import jax.numpy as jnp
from jax.experimental import pallas as pl
from jax.experimental.pallas import tpu as pltpu


def _scale_kernel(a_ref, x_ref, o_ref):
    # a_ref: SMEM scalar (1,) float32    x_ref/o_ref: VMEM tiles (native dtype)
    # a_ref[0] * x promotes to f32 if x is bf16; cast back to the output dtype.
    o_ref[...] = (a_ref[0] * x_ref[...]).astype(o_ref.dtype)


def nn_module_forward(a, x, tile_rows=4096):
    """Pallas implementation of NNModule.forward: return a * x.

    a: python float / 0-d value (the module's `self.a`)
    x: jnp array of any shape (e.g. NCHW), any float dtype
    tile_rows: rows (of 128 lanes) per grid step; 4096 ~= 2 MiB f32 tile, a
               safe cross-generation default (v5e scoped VMEM = 16 MiB).
    """
    orig_shape = x.shape
    dtype = x.dtype
    n = x.size
    lanes = 128

    # Rows needed, aligned to the sublane granularity (8).
    rows = -(-n // lanes)
    rows_aligned = -(-rows // 8) * 8

    if rows_aligned <= tile_rows:
        # Single tile covers everything; no grid remainder possible.
        tile_rows = rows_aligned
        rows_padded = rows_aligned
    else:
        # Round the row count up to a multiple of tile_rows so the grid
        # divides exactly (no silently-dropped trailing rows).
        rows_padded = -(-rows_aligned // tile_rows) * tile_rows

    padded = rows_padded * lanes
    grid = (rows_padded // tile_rows,)

    # Flatten in the native dtype; only pad when actually required.
    x_flat = jnp.ravel(x)
    if padded != n:
        x_flat = jnp.pad(x_flat, (0, padded - n))
    x2d = x_flat.reshape(rows_padded, lanes)

    a_arr = jnp.asarray([a], dtype=jnp.float32)

    out2d = pl.pallas_call(
        _scale_kernel,
        out_shape=jax.ShapeDtypeStruct((rows_padded, lanes), dtype),
        grid_spec=pltpu.PrefetchScalarGridSpec(
            num_scalar_prefetch=0,
            grid=grid,
            in_specs=[
                pl.BlockSpec(memory_space=pltpu.SMEM),               # scalar a
                pl.BlockSpec((tile_rows, lanes), lambda i: (i, 0)),  # x tile
            ],
            out_specs=pl.BlockSpec((tile_rows, lanes), lambda i: (i, 0)),
        ),
        compiler_params=pltpu.CompilerParams(
            dimension_semantics=("parallel",),
        ),
    )(a_arr, x2d)

    # Only pay the slice copy when padding was actually added.
    if padded != n:
        out = out2d.reshape(-1)[:n].reshape(orig_shape)
    else:
        out = out2d.reshape(orig_shape)
    return out


if __name__ == "__main__":
    key = jax.random.PRNGKey(0)

    # Deterministic "parameter" a (NNModule.__init__'s `a`), scalar.
    a = 1.5

    # Small NCHW input consistent with typical conv-style usage.
    x = jax.random.normal(key, (2, 4, 16, 16), dtype=jnp.float32)

    y = nn_module_forward(a, x)
    y = jax.block_until_ready(y)

    # Verify against the trivial reference: a * x
    ref = a * x
    assert y.shape == x.shape and y.dtype == x.dtype
    assert jnp.allclose(y, ref, atol=1e-6, rtol=1e-6)

    # Also sanity-check a non-lane-aligned, larger bf16 input (exercises the
    # padding path, multi-step grid, and native-dtype streaming).
    x2 = jax.random.normal(jax.random.PRNGKey(1), (3, 5, 17, 19),
                           dtype=jnp.bfloat16)
    y2 = jax.block_until_ready(nn_module_forward(a, x2, tile_rows=1024))
    ref2 = (jnp.float32(a) * x2.astype(jnp.float32)).astype(jnp.bfloat16)
    assert y2.shape == x2.shape and y2.dtype == x2.dtype
    assert jnp.allclose(y2.astype(jnp.float32), ref2.astype(jnp.float32),
                        atol=1e-2, rtol=1e-2)

    print("KERNEL_OK")
</pallas_src>

<mosaic_0001>
module attributes {stable_mosaic.version = 11 : i64} {
  func.func @_scale_kernel(%arg0: i32, %arg1: memref<1xf32, #tpu.memory_space<smem>>, %arg2: memref<16x128xf32, #tpu.memory_space<vmem>>, %arg3: memref<16x128xf32, #tpu.memory_space<vmem>>) attributes {dimension_semantics = [#tpu.dimension_semantics<parallel>], iteration_bounds = array<i64: 1>, scalar_prefetch = 0 : i64, scratch_operands = 0 : i64, tpu.core_type = #tpu.core_type<tc>, window_params = [{transform_indices = @transform_0, window_bounds = array<i64: 1>}, {transform_indices = @transform_1, window_bounds = array<i64: 16, 128>}, {transform_indices = @transform_2, window_bounds = array<i64: 16, 128>}]} {
    %c0 = arith.constant 0 : index
    %0 = memref.load %arg1[%c0] : memref<1xf32, #tpu.memory_space<smem>>
    %c0_0 = arith.constant 0 : index
    %c0_1 = arith.constant 0 : index
    %1 = vector.load %arg2[%c0_0, %c0_1] : memref<16x128xf32, #tpu.memory_space<vmem>>, vector<16x128xf32>
    %2 = vector.broadcast %0 : f32 to vector<16x128xf32>
    %3 = arith.mulf %2, %1 : vector<16x128xf32>
    %c0_2 = arith.constant 0 : index
    %c0_3 = arith.constant 0 : index
    %4 = vector.load %arg3[%c0_2, %c0_3] : memref<16x128xf32, #tpu.memory_space<vmem>>, vector<16x128xf32>
    tpu.vector_store %arg3[%c0_2, %c0_3], %3 {strides = array<i32>} : memref<16x128xf32, #tpu.memory_space<vmem>>, vector<16x128xf32>,
    return
  }
  func.func @transform_0(%arg0: i32) -> i32 {
    %c0_i32 = arith.constant 0 : i32
    %c0_i32_0 = arith.constant 0 : i32
    return %c0_i32 : i32
  }
  func.func @transform_1(%arg0: i32) -> (i32, i32) {
    %c0_i32 = arith.constant 0 : i32
    %c0_i32_0 = arith.constant 0 : i32
    return %arg0, %c0_i32 : i32, i32
  }
  func.func @transform_2(%arg0: i32) -> (i32, i32) {
    %c0_i32 = arith.constant 0 : i32
    %c0_i32_0 = arith.constant 0 : i32
    return %arg0, %c0_i32 : i32, i32
  }
}

</mosaic_0001>

<bundles_post_ra>
// kernel: tpu_custom_call.1
= control target key start
LH: loop header
LB: loop body
LE: loop exit
PB: predicated region body
PF: predicated region fallthrough
CT: control target
= control target key end

     0   :  { %8 = vsyncpa [#allocation4], 0  ;;  %s140_s0 = inlined_call_operand.<no memory space> [shape: f32[1], index: 0, kind: input, shape index: {}]   ;;  %s141_s1 = inlined_call_operand.hbm [shape: f32[16,128], index: 1, kind: input, shape index: {}]   ;;  %s142_s2 = inlined_call_operand.hbm [shape: f32[16,128], index: 2, kind: output, shape index: {}]  }
   0x1   :  { %9 = vsyncpa [#allocation5], 0  ;;  %s16_s11 = sshll.u32 %s141_s1, 4  ;;  %s112_s12 = smov [#allocation3]   ;;  %s17_s11 = int_to_ptr.hbm [resolvable:$true] %s16_s11 }
   0x2   :  { %s18_s13 = sshll.u32 %s112_s12, 4  ;;  %s113_s14 = smov 128   ;;  %s19_s13 = int_to_ptr.vmem [resolvable:$true] %s18_s13 }
   0x3   :  { %s114_s15 = smov 8  }
   0x4   :  { %24 = dma.hbm_to_vmem [thread:$0]  %s17_s11, 256, %s19_s13, [#allocation4], %s113_s14, %s113_s14, %s114_s15  }
   0x5   :  { %108 = dma.done.wait [#allocation4], 256  }
   0x6   :  { %109 = vsyncadd [#allocation4], 4294967040  ;;  %v32_v0 = vstv %s140_s0  ;;  %s115_s18 = smov [#allocation6]   ;;  %s43_s22 = sshll.u32 %s142_s2, 4  ;;  %v30_v1 = vld [vmem:[#allocation3] sm:$0xff]  ;;  %v31_v2 = vld [vmem:[#allocation3 + $0x8] sm:$0xff]  ;;  %s44_s22 = int_to_ptr.hbm [resolvable:$true] %s43_s22 }
   0x7   :  { %s41_s19 = sshll.u32 %s115_s18, 4  ;;  %v33_v3 = vmul.f32 %v32_v0, %v30_v1  ;;  %v34_v4 = vmul.f32 %v32_v0, %v31_v2  ;;  %s42_s19 = int_to_ptr.vmem [resolvable:$true] %s41_s19 }
   0x9   :  { %35 = vst [vmem:[#allocation6] sm:$0xff] %v33_v3 }
   0xa   :  { %36 = vst [vmem:[#allocation6 + $0x8] sm:$0xff] %v34_v4 }
   0xb   :  { %49 = dma.vmem_to_hbm [thread:$0]  %s42_s19, 256, %s44_s22, [#allocation5], %s113_s14, %s113_s14, %s114_s15  }
   0xc   :  { %110 = dma.done.wait [#allocation5], 256  }
   0xd   :  { %111 = vsyncadd [#allocation5], 4294967040 }
   0xe   :  { %54 = vsyncpa [#allocation4], 1 }
   0xf   :  { %55 = vsyncpa [#allocation5], 1 }

</bundles_post_ra>
